<compile_context>
chip_gen: v7x
topology: tpu7x:2x2x1
jax: 0.10.0
libtpu: 0.0.40
codegen_flags: <defaults>
</compile_context>

<pallas_src>
import functools

import jax
import jax.numpy as jnp
from jax.experimental import pallas as pl
from jax.experimental.pallas import tpu as pltpu


GELU_ALPHA2 = 1.59576912160573
GELU_BETA2 = 0.071355


def _fused_conv_act_kernel(w_ref, p_ref, cb_ref, eb_ref, o_ref):
    """One M-tile: (Cout, K) @ (K, TM) matmul + conv bias + fused activations."""
    # Conv as matmul: weights (Cout, K) bf16 x patches (K, TM) bf16, f32 accum.
    x = jnp.dot(w_ref[...], p_ref[...], preferred_element_type=jnp.float32)
    x = x + cb_ref[...]                       # conv bias, (Cout, 1) -> lanes
    x = jnp.maximum(x, 0.0)                   # relu
    inner = GELU_ALPHA2 * x + GELU_BETA2 * (x * x * x)
    x = x * jax.nn.sigmoid(inner)             # "gelu-like" gate
    x = jax.nn.sigmoid(x)                     # sigmoid
    x = x + eb_ref[...]                       # extra learned per-channel bias
    o_ref[...] = x                            # lane-dense (Cout, TM) store


def _im2col_3d_t(x, k):
    """x: (N, Cin, D, H, W) -> transposed patches (Cin*k^3, N*Do*Ho*Wo).

    Row order is (ci, kd, kh, kw), matching PyTorch Conv3d weight.reshape(Cout, -1).
    Column order is (n, do, ho, wo).
    """
    N, C, D, H, W = x.shape
    Do, Ho, Wo = D - k + 1, H - k + 1, W - k + 1
    slices = []
    for dz in range(k):
        for dy in range(k):
            for dx in range(k):
                slices.append(x[:, :, dz:dz + Do, dy:dy + Ho, dx:dx + Wo])
    p = jnp.stack(slices, axis=0)                 # (k^3, N, C, Do, Ho, Wo)
    p = jnp.transpose(p, (2, 0, 1, 3, 4, 5))      # (C, k^3, N, Do, Ho, Wo)
    return p.reshape(C * k * k * k, N * Do * Ho * Wo), (N, Do, Ho, Wo)


def _pick_tm(m):
    """Lane tile along M: big enough to amortize per-step overhead, small enough
    to keep >=2 grid steps when M allows (v7x megacore)."""
    if m >= 4096:
        return 2048
    if m >= 1024:
        return 512
    return 256


@functools.partial(jax.jit, static_argnames=("kernel_size",))
def model_forward(x, conv_w, conv_b, extra_bias, *, kernel_size):
    """Reproduces Model.forward.

    x:          (N, Cin, D, H, W)  any float dtype (quantized like x.half())
    conv_w:     (Cout, Cin, k, k, k) fp16
    conv_b:     (Cout,) fp16
    extra_bias: (Cout, 1, 1, 1) fp16
    returns:    (N, Cout, Do, Ho, Wo) float32
    """
    k = kernel_size
    Cout = conv_w.shape[0]

    # Emulate .half() quantization, then bf16 operands for a single-pass MXU matmul
    # (halves the HBM bytes of the dominant patch stream vs fp32).
    x_q = x.astype(jnp.float16).astype(jnp.bfloat16)
    patches, (N, Do, Ho, Wo) = _im2col_3d_t(x_q, k)           # (K, M) bf16
    w_mat = conv_w.astype(jnp.bfloat16).reshape(Cout, -1)     # (Cout, K) bf16
    cb = conv_b.astype(jnp.float32).reshape(Cout, 1)          # (Cout, 1)
    eb = extra_bias.astype(jnp.float32).reshape(Cout, 1)      # (Cout, 1)

    K, M = patches.shape
    TM = _pick_tm(M)
    M_pad = ((M + TM - 1) // TM) * TM
    patches = jnp.pad(patches, ((0, 0), (0, M_pad - M)))

    out = pl.pallas_call(
        _fused_conv_act_kernel,
        out_shape=jax.ShapeDtypeStruct((Cout, M_pad), jnp.float32),
        grid_spec=pltpu.PrefetchScalarGridSpec(
            num_scalar_prefetch=0,
            grid=(M_pad // TM,),
            in_specs=[
                pl.BlockSpec((Cout, K), lambda i: (0, 0)),   # full weight (resident)
                pl.BlockSpec((K, TM), lambda i: (0, i)),     # patch tile, M on lanes
                pl.BlockSpec((Cout, 1), lambda i: (0, 0)),   # conv bias
                pl.BlockSpec((Cout, 1), lambda i: (0, 0)),   # extra bias
            ],
            out_specs=pl.BlockSpec((Cout, TM), lambda i: (0, i)),  # lane-dense
        ),
        compiler_params=pltpu.CompilerParams(
            dimension_semantics=("parallel",)),
    )(w_mat, patches, cb, eb)

    out = out[:, :M]
    # Triton kernel stores fp16 and forward returns out.float(): round through fp16.
    out = out.astype(jnp.float16).astype(jnp.float32)
    out = out.reshape(Cout, N, Do, Ho, Wo)
    return jnp.transpose(out, (1, 0, 2, 3, 4))                # back to NCDHW


if __name__ == "__main__":
    # Small config consistent with the module:
    # in_channels=3, out_channels=8, kernel_size=3, bias_shape=(8, 1, 1, 1)
    N, Cin, Cout, k = 2, 3, 8, 3
    D = H = W = 8

    key = jax.random.PRNGKey(0)
    kx, kw, kb, ke = jax.random.split(key, 4)

    x = jax.random.normal(kx, (N, Cin, D, H, W), dtype=jnp.float32)
    fan_in = Cin * k * k * k
    bound = 1.0 / jnp.sqrt(fan_in)
    conv_w = jax.random.uniform(kw, (Cout, Cin, k, k, k), minval=-bound,
                                maxval=bound).astype(jnp.float16)
    conv_b = jax.random.uniform(kb, (Cout,), minval=-bound,
                                maxval=bound).astype(jnp.float16)
    extra_bias = jax.random.normal(ke, (Cout, 1, 1, 1)).astype(jnp.float16)

    out = model_forward(x, conv_w, conv_b, extra_bias, kernel_size=k)
    out = jax.block_until_ready(out)
    assert out.shape == (N, Cout, D - k + 1, H - k + 1, W - k + 1)
    assert out.dtype == jnp.float32
    print("KERNEL_OK")
</pallas_src>

<mosaic_0001>
module attributes {stable_mosaic.version = 11 : i64} {
  func.func @_fused_conv_act_kernel(%arg0: i32, %arg1: memref<8x81xbf16, #tpu.memory_space<vmem>>, %arg2: memref<81x256xbf16, #tpu.memory_space<vmem>>, %arg3: memref<8x1xf32, #tpu.memory_space<vmem>>, %arg4: memref<8x1xf32, #tpu.memory_space<vmem>>, %arg5: memref<8x256xf32, #tpu.memory_space<vmem>>) attributes {dimension_semantics = [#tpu.dimension_semantics<parallel>], iteration_bounds = array<i64: 2>, scalar_prefetch = 0 : i64, scratch_operands = 0 : i64, tpu.core_type = #tpu.core_type<tc>, window_params = [{pipeline_mode = #tpu.pipeline_mode<synchronous>, transform_indices = @transform_0, window_bounds = array<i64: 8, 81>}, {transform_indices = @transform_1, window_bounds = array<i64: 81, 256>}, {pipeline_mode = #tpu.pipeline_mode<synchronous>, transform_indices = @transform_2, window_bounds = array<i64: 8, 1>}, {pipeline_mode = #tpu.pipeline_mode<synchronous>, transform_indices = @transform_3, window_bounds = array<i64: 8, 1>}, {transform_indices = @transform_4, window_bounds = array<i64: 8, 256>}]} {
    %c0 = arith.constant 0 : index
    %c0_0 = arith.constant 0 : index
    %0 = vector.load %arg1[%c0, %c0_0] : memref<8x81xbf16, #tpu.memory_space<vmem>>, vector<8x81xbf16>
    %c0_1 = arith.constant 0 : index
    %c0_2 = arith.constant 0 : index
    %1 = vector.load %arg2[%c0_1, %c0_2] : memref<81x256xbf16, #tpu.memory_space<vmem>>, vector<81x256xbf16>
    %cst = arith.constant dense<0.000000e+00> : vector<8x256xf32>
    %2 = tpu.matmul %0, %1, %cst {dimension_numbers = #tpu.dot_dimension_numbers<[1], [0], [0], [1], [0, 0, 1, 1], [], []>} : vector<8x81xbf16>, vector<81x256xbf16>, vector<8x256xf32> -> vector<8x256xf32>
    %c0_3 = arith.constant 0 : index
    %c0_4 = arith.constant 0 : index
    %3 = vector.load %arg3[%c0_3, %c0_4] : memref<8x1xf32, #tpu.memory_space<vmem>>, vector<8x1xf32>
    %4 = vector.broadcast %3 : vector<8x1xf32> to vector<8x256xf32>
    %5 = arith.addf %2, %4 : vector<8x256xf32>
    %cst_5 = arith.constant 0.000000e+00 : f32
    %6 = vector.broadcast %cst_5 : f32 to vector<8x256xf32>
    %7 = arith.maximumf %5, %6 : vector<8x256xf32>
    %cst_6 = arith.constant 1.59576917 : f32
    %8 = vector.broadcast %cst_6 : f32 to vector<8x256xf32>
    %9 = arith.mulf %8, %7 : vector<8x256xf32>
    %10 = arith.mulf %7, %7 : vector<8x256xf32>
    %11 = arith.mulf %10, %7 : vector<8x256xf32>
    %cst_7 = arith.constant 7.135500e-02 : f32
    %12 = vector.broadcast %cst_7 : f32 to vector<8x256xf32>
    %13 = arith.mulf %12, %11 : vector<8x256xf32>
    %14 = arith.addf %9, %13 : vector<8x256xf32>
    %15 = arith.negf %14 : vector<8x256xf32>
    %16 = math.exp %15 : vector<8x256xf32>
    %cst_8 = arith.constant 1.000000e+00 : f32
    %17 = vector.broadcast %cst_8 : f32 to vector<8x256xf32>
    %18 = arith.addf %17, %16 : vector<8x256xf32>
    %19 = arith.divf %17, %18 : vector<8x256xf32>
    %20 = arith.mulf %7, %19 : vector<8x256xf32>
    %21 = arith.negf %20 : vector<8x256xf32>
    %22 = math.exp %21 : vector<8x256xf32>
    %cst_9 = arith.constant 1.000000e+00 : f32
    %23 = vector.broadcast %cst_9 : f32 to vector<8x256xf32>
    %24 = arith.addf %23, %22 : vector<8x256xf32>
    %25 = arith.divf %23, %24 : vector<8x256xf32>
    %c0_10 = arith.constant 0 : index
    %c0_11 = arith.constant 0 : index
    %26 = vector.load %arg4[%c0_10, %c0_11] : memref<8x1xf32, #tpu.memory_space<vmem>>, vector<8x1xf32>
    %27 = vector.broadcast %26 : vector<8x1xf32> to vector<8x256xf32>
    %28 = arith.addf %25, %27 : vector<8x256xf32>
    %c0_12 = arith.constant 0 : index
    %c0_13 = arith.constant 0 : index
    %29 = vector.load %arg5[%c0_12, %c0_13] : memref<8x256xf32, #tpu.memory_space<vmem>>, vector<8x256xf32>
    tpu.vector_store %arg5[%c0_12, %c0_13], %28 {strides = array<i32>} : memref<8x256xf32, #tpu.memory_space<vmem>>, vector<8x256xf32>,
    return
  }
  func.func @transform_0(%arg0: i32) -> (i32, i32) {
    %c0_i32 = arith.constant 0 : i32
    %c0_i32_0 = arith.constant 0 : i32
    %c0_i32_1 = arith.constant 0 : i32
    return %c0_i32, %c0_i32_0 : i32, i32
  }
  func.func @transform_1(%arg0: i32) -> (i32, i32) {
    %c0_i32 = arith.constant 0 : i32
    %c0_i32_0 = arith.constant 0 : i32
    return %c0_i32, %arg0 : i32, i32
  }
  func.func @transform_2(%arg0: i32) -> (i32, i32) {
    %c0_i32 = arith.constant 0 : i32
    %c0_i32_0 = arith.constant 0 : i32
    %c0_i32_1 = arith.constant 0 : i32
    return %c0_i32, %c0_i32_0 : i32, i32
  }
  func.func @transform_3(%arg0: i32) -> (i32, i32) {
    %c0_i32 = arith.constant 0 : i32
    %c0_i32_0 = arith.constant 0 : i32
    %c0_i32_1 = arith.constant 0 : i32
    return %c0_i32, %c0_i32_0 : i32, i32
  }
  func.func @transform_4(%arg0: i32) -> (i32, i32) {
    %c0_i32 = arith.constant 0 : i32
    %c0_i32_0 = arith.constant 0 : i32
    return %c0_i32, %arg0 : i32, i32
  }
}

</mosaic_0001>

<bundles_post_ra>
// kernel: model_forward.1
= control target key start
LH: loop header
LB: loop body
LE: loop exit
PB: predicated region body
PF: predicated region fallthrough
CT: control target
= control target key end

     0   :  { %s653_s15 = smov 0   ;;  %s655_s16 = smov 0   ;;  %s714_s0 = inlined_call_operand.vmem [shape: bf16[8,81], index: 0, kind: input, shape index: {}]   ;;  %s715_s1 = inlined_call_operand.vmem [shape: bf16[81,512], index: 1, kind: input, shape index: {}]   ;;  %s716_s2 = inlined_call_operand.vmem [shape: f32[8,1], index: 2, kind: input, shape index: {}]   ;;  %s717_s3 = inlined_call_operand.vmem [shape: f32[8,1], index: 3, kind: input, shape index: {}]   ;;  %s718_s4 = inlined_call_operand.vmem [shape: f32[8,512], index: 4, kind: output, shape index: {}]  }
   0x1   :  { %s657_s17 = smov 0  }
   0x2 LB: > { %s513_s18 = sadd.s32 4294967295, %s625_s17   ;;  %s670_s19 = sadd.s32 1, %s625_s17   ;;  %s625_s17 = sphi %s657_s17, %s721_s17   ;;  %s621_s16 = sphi %s655_s16, %s720_s16   ;;  %s617_s15 = sphi %s653_s15, %s719_s15  }
   0x3   : > { %s39_s20 = ssub.s32 %s625_s17, %s670_s19  ;;  %s42_s21 = sadd.s32 1, %s621_s16 }
   0x4   : > { %p40_p0 = scmp.eq.s32.totalorder %s39_s20, 0  ;;  %p49_p1 = scmp.ne.s32.totalorder %s621_s16, %s617_s15 }
   0x5   : > { %p50_p2 = scmp.eq.s32.totalorder %s625_s17, 0  ;;  %p516_p4 = scmp.ge.s32.totalorder %s625_s17, 2 }
   0x6   : > { %s679_s22 = scalar_select %p40_p0, %s621_s16, %s42_s21  }
   0x7   : > { %p51_p3 = por %p50_p2, %p49_p1  ;;  %152 = sbr.rel (%p516_p4) target bundleno = 24 (0x18), region = 28 }
   0xe   : > { %155 = sbr.rel (!%p51_p3) target bundleno = 24 (0x18), region = 32  ;;  %s157_s23 = sand.u32 (%p51_p3), 1, %s621_s16  }
   0xf   : > { %s541_s24 = sshll.u32 (%p51_p3), %s625_s17, 3  ;;  %s542_s25 = smul.u32 (%p51_p3), 88, %s157_s23 }
  0x10   : > { %s162_s28 = scalar_lea.vmem (%p51_p3), %s715_s1, %s541_s24 }
  0x11   : > { %v210_v0 = vld [vmem:[%s162_s28] sm:$0xff] (%p51_p3)  ;;  %v212_v1 = vld [vmem:[%s162_s28 + $0x10] sm:$0xff] (%p51_p3)  ;;  %s159_s29 = scalar_lea.vmem (%p51_p3), [#allocation2], %s542_s25 }
  0x12   : > { %v214_v2 = vld [vmem:[%s162_s28 + $0x20] sm:$0xff] (%p51_p3)  ;;  %v216_v3 = vld [vmem:[%s162_s28 + $0x30] sm:$0xff] (%p51_p3)  ;;  %211 = vst [vmem:[%s159_s29] sm:$0xff] (%p51_p3), %v210_v0  ;;  %213 = vst [vmem:[%s159_s29 + $0x8] sm:$0xff] (%p51_p3), %v212_v1 }
  0x13   : > { %v218_v4 = vld [vmem:[%s162_s28 + $0x40] sm:$0xff] (%p51_p3)  ;;  %v220_v5 = vld [vmem:[%s162_s28 + $0x50] sm:$0xff] (%p51_p3)  ;;  %215 = vst [vmem:[%s159_s29 + $0x10] sm:$0xff] (%p51_p3), %v214_v2  ;;  %217 = vst [vmem:[%s159_s29 + $0x18] sm:$0xff] (%p51_p3), %v216_v3 }
  0x14   : > { %219 = vst [vmem:[%s159_s29 + $0x20] sm:$0xff] (%p51_p3), %v218_v4  ;;  %221 = vst [vmem:[%s159_s29 + $0x28] sm:$0xff] (%p51_p3), %v220_v5  ;;  %v222_v6 = vld [vmem:[%s162_s28 + $0x60] sm:$0xff] (%p51_p3)  ;;  %v224_v7 = vld [vmem:[%s162_s28 + $0x70] sm:$0xff] (%p51_p3) }
  0x15   : > { %v226_v8 = vld [vmem:[%s162_s28 + $0x80] sm:$0xff]  ;;  %223 = vst [vmem:[%s159_s29 + $0x30] sm:$0xff] %v222_v6  ;;  %225 = vst [vmem:[%s159_s29 + $0x38] sm:$0xff] %v224_v7  ;;  %v228_v9 = vld [vmem:[%s162_s28 + $0x90] sm:$0xff] }
  0x16   : > { %227 = vst [vmem:[%s159_s29 + $0x40] sm:$0xff] %v226_v8  ;;  %v230_v10 = vld [vmem:[%s162_s28 + $0xa0] sm:$0xff]  ;;  %229 = vst [vmem:[%s159_s29 + $0x48] sm:$0xff] %v228_v9 }
  0x17   : > { %231 = vst [vmem:[%s159_s29 + $0x50] sm:$0xff] %v230_v10 }
  0x18 PF: > { %p519_p5 = scmp.ge.s32.totalorder %s625_s17, 1  ;;  %p236_p6 = scmp.lt.s32.totalorder %s625_s17, 3 }
  0x1a   : > { %p237_p7 = pnand %p519_p5, %p236_p6 }
  0x1b   : > { %s243_s30 = sand.u32 (!%p237_p7), 1, %s617_s15   ;;  %v627_v11 = vmov (!%p237_p7), 0   ;;  %v288_v12 = vld [vmem:[%s716_s2] sm:$0xff] (!%p237_p7)  ;;  %vm353_vm0 = vcmask (!%p237_p7), 1040384   ;;  %vm349_vm1 = vcmask (!%p237_p7), 662528   ;;  %s520_s13 = sshll.u32 (!%p237_p7), %s513_s18, 1 }
  0x1c   : > { %240 = sbr.rel (%p237_p7) target bundleno = 339 (0x153), region = 70  ;;  %394 = vmatprep.mubr.bf16.mxu0 (!%p237_p7), %v627_v11  ;;  %569 = vset.pattern.permute.xlu0 (!%p237_p7), %v627_v11  ;;  %v441_v13 = vld [vmem:[%s717_s3] sm:$0xff] (!%p237_p7)  ;;  %v355_v25 = vsel (!%p237_p7), %vm353_vm0, 65535, %v627_v11  ;;  %p270_p8 = scmp.lt.s32.totalorder (!%p237_p7), %s520_s13, 3 }
  0x1d   : > { %s543_s5 = smul.u32 (!%p237_p7), 88, %s243_s30  ;;  %291 = vperm.xlu0 (!%p237_p7), %569, %v288_v12   ;;  %v276_v30 = vld [vmem:[%s714_s0] sm:$0xf] (!%p237_p7) }
  0x1f   : > { %s245_s10 = scalar_lea.vmem (!%p237_p7), [#allocation2], %s543_s5 }
  0x20   : > { %v570_v14 = vld [vmem:[%s245_s10 + $0x4] ss:$8 sps:$4 sm:$0xff] (!%p237_p7)   ;;  %v572_v15 = vld [vmem:[%s245_s10] ss:$8 sps:$4 sm:$0xff] (!%p237_p7)   ;;  %v573_v16 = vld [vmem:[%s245_s10 + $0x14] ss:$8 sps:$4 sm:$0xff] (!%p237_p7)  }
  0x21   : > { %362 = vmatprep.subr.bf16.mxu0 (!%p237_p7), %v570_v14  ;;  %444 = vperm.xlu0 (!%p237_p7), %569, %v441_v13   ;;  %v575_v17 = vld [vmem:[%s245_s10 + $0x10] ss:$8 sps:$4 sm:$0xff] (!%p237_p7)   ;;  %v576_v18 = vld [vmem:[%s245_s10 + $0x24] ss:$8 sps:$4 sm:$0xff] (!%p237_p7)   ;;  %v578_v19 = vld [vmem:[%s245_s10 + $0x20] ss:$8 sps:$4 sm:$0xff] (!%p237_p7)  }
  0x22   : > { %363 = vmatpush1.bf16.msra.mxu0 (!%p237_p7), %v572_v15  ;;  %v579_v20 = vld [vmem:[%s245_s10 + $0x34] ss:$8 sps:$4 sm:$0xff] (!%p237_p7)   ;;  %v581_v22 = vld [vmem:[%s245_s10 + $0x30] ss:$8 sps:$4 sm:$0xff] (!%p237_p7)   ;;  %v582_v23 = vld [vmem:[%s245_s10 + $0x44] ss:$8 sps:$4 sm:$0xff] (!%p237_p7)  }
  0x23   : > { %364 = vmatprep.subr.bf16.mxu0 %v573_v16  ;;  %v287_v21 = vld [vmem:[%s245_s10 + $0x50] sm:$0x11]  ;;  %v584_v26 = vld [vmem:[%s245_s10 + $0x40] ss:$8 sps:$4 sm:$0xff]   ;;  %s723_s13 = smov (!%p270_p8, %s520_s13), 3 }
  0x24   : > { %v533_v24 = vcombine.high %v287_v21, %v287_v21  ;;  %v532_v27 = vcombine.low %v287_v21, %v287_v21  ;;  %s521_s14 = sshll.u32 %s723_s13, 3 }
  0x25   : > { %s273_s21 = scalar_lea.vmem %s718_s4, %s521_s14 }
  0x26   : > { %365 = vmatpush1.bf16.msra.mxu0 %v575_v17  ;;  %v360_v28 = vand.u32 %v533_v24, %v355_v25  ;;  %v357_v29 = vand.u32 %v532_v27, %v355_v25 }
  0x27   : > { %366 = vmatprep.subr.bf16.mxu0 %v576_v18 }
  0x2a   : > { %367 = vmatpush1.bf16.msra.mxu0 %v578_v19 }
  0x2b   : > { %368 = vmatprep.subr.bf16.mxu0 %v579_v20 }
  0x2e   : > { %369 = vmatpush1.bf16.msra.mxu0 %v581_v22 }
  0x2f   : > { %370 = vmatprep.subr.bf16.mxu0 %v582_v23 }
  0x32   : > { %371 = vmatpush1.bf16.msra.mxu0 %v584_v26 }
  0x33   : > { %372 = vmatprep.subr.bf16.mxu0 %v360_v28 }
  0x36   : > { %373 = vmatpush1.bf16.msra.mxu0 %v357_v29 }
  0x39   : > { %534 = vmatmul.mubr.msk.bf16.vlgmr.msra.gmra.mrb[0].mxu0 %vm349_vm1, %v276_v30 }
  0x9c   : > { %v292_v31 = vpop.permute.xlu0 %291 }
  0xa0   : > { %v445_v3 = vpop.permute.xlu0 %444 }
 0x10c   : > { %v396_v32 = vpop.f32.mrb[0].mxu0 }
 0x10d   : > { %v397_v33 = vadd.f32 %v396_v32, %v292_v31  ;;  %v398_v34 = vpop.f32.mrb[1].mxu0 }
 0x10e   : > { %v399_v35 = vadd.f32 %v398_v34, %v292_v31  ;;  %v400_v36 = vpop.f32.mrb[2].mxu0 }
 0x10f   : > { %v403_v37 = vmax.f32 %v397_v33, 0.0  ;;  %v401_v38 = vpop.f32.mrb[3].mxu0 }
 0x110   : > { %v404_v39 = vmax.f32 %v399_v35, 0.0 }
 0x111   : > { %v407_v40 = vmul.f32 %v403_v37, %v403_v37  ;;  %v405_v44 = vmul.f32 1.5957692, %v403_v37 }
 0x112   : > { %v408_v41 = vmul.f32 %v404_v39, %v404_v39  ;;  %v406_v46 = vmul.f32 1.5957692, %v404_v39 }
 0x113   : > { %v409_v42 = vmul.f32 %v407_v40, %v403_v37 }
 0x114   : > { %v410_v43 = vmul.f32 %v408_v41, %v404_v39 }
 0x115   : > { %v411_v45 = vmul.f32 0.071355, %v409_v42 }
 0x116   : > { %v412_v47 = vmul.f32 0.071355, %v410_v43 }
 0x117   : > { %v413_v48 = vadd.f32 %v411_v45, %v405_v44 }
 0x118   : > { %v414_v49 = vadd.f32 %v412_v47, %v406_v46 }
 0x119   : > { %v535_v50 = vmul.f32 -1.442695, %v413_v48 }
 0x11a   : > { %v536_v51 = vmul.f32 -1.442695, %v414_v49 }
 0x11b   : > { %587 = vpow2.f32 %v535_v50 }
 0x11c   : > { %589 = vpow2.f32 %v536_v51 }
 0x125   : > { %v588_v52 = vpop.eup %587 }
 0x126   : > { %v590_v53 = vpop.eup %589  ;;  %v421_v54 = vadd.f32 1.0, %v588_v52 }
 0x127   : > { %v422_v55 = vadd.f32 1.0, %v590_v53 }
 0x128   : > { %591 = vrcp.f32 %v421_v54 }
 0x129   : > { %593 = vrcp.f32 %v422_v55 }
 0x132   : > { %v592_v56 = vpop.eup %591 }
 0x133   : > { %v594_v57 = vpop.eup %593  ;;  %v427_v58 = vmul.f32 %v592_v56, %v403_v37 }
 0x134   : > { %v428_v59 = vmul.f32 %v594_v57, %v404_v39 }
 0x135   : > { %v537_v60 = vmul.f32 -1.442695, %v427_v58 }
 0x136   : > { %v538_v61 = vmul.f32 -1.442695, %v428_v59 }
 0x137   : > { %595 = vpow2.f32 %v537_v60 }
 0x138   : > { %597 = vpow2.f32 %v538_v61 }
 0x141   : > { %v596_v62 = vpop.eup %595 }
 0x142   : > { %v598_v63 = vpop.eup %597  ;;  %v435_v0 = vadd.f32 1.0, %v596_v62 }
 0x143   : > { %v436_v1 = vadd.f32 1.0, %v598_v63 }
 0x144   : > { %599 = vrcp.f32 %v435_v0 }
 0x145   : > { %601 = vrcp.f32 %v436_v1 }
 0x14e   : > { %v600_v2 = vpop.eup %599 }
 0x14f   : > { %v602_v4 = vpop.eup %601  ;;  %v447_v5 = vadd.f32 %v600_v2, %v445_v3 }
 0x150   : > { %v448_v6 = vadd.f32 %v602_v4, %v445_v3 }
 0x151   : > { %449 = vst [vmem:[%s273_s21] sm:$0xff] %v447_v5 }
 0x152   : > { %450 = vst [vmem:[%s273_s21 + $0x8] sm:$0xff] %v448_v6 }
 0x153 PF: > { %p11_p9 = scmp.ge.s32.totalorder %s670_s19, 4   ;;  %s719_s15 = smov %s621_s16 }
 0x154   : > { %s720_s16 = smov %s679_s22  ;;  %s721_s17 = smov %s670_s19 }
 0x155   :  { %13 = sbr.rel (!%p11_p9) target bundleno = 2 (0x2), region = 109 }

</bundles_post_ra>
